<compile_context>
chip_gen: v7x
topology: tpu7x:2x2x1
jax: 0.10.0
libtpu: 0.0.40
codegen_flags: <defaults>
</compile_context>

<pallas_src>
import functools

import jax
import jax.numpy as jnp
from jax import lax
from jax.experimental import pallas as pl
from jax.experimental.pallas import tpu as pltpu


# ------------------------------ Pallas kernel -------------------------------


def _fire_shuffle_kernel(x_ref, wsq_ref, bsq_ref, we1_ref, be1_ref,
                         we3_ref, be3_ref, pmat_ref, mask_ref, o_ref,
                         *, ce1, ce3, W):
    # x_ref    : (1, Cin, HW)     one image, NCHW-flat (channels on sublanes)
    # wsq_ref  : (Csq, Cin)       squeeze 1x1 weight (torch O,I layout)
    # bsq_ref  : (Csq, 1)
    # we1_ref  : (Ce1, Csq)       expand1x1 weight
    # be1_ref  : (Ce1, 1)
    # we3_ref  : (9*Ce3, Csq)     rows [t*Ce3:(t+1)*Ce3] = expand3x3 tap-t weight
    # be3_ref  : (Ce3, 1)
    # pmat_ref : (HW, HW) bf16    one-hot pixel-permutation matrix (exact 0/1)
    # mask_ref : (9, 1, HW) f32   per-tap zero-padding boundary masks
    # o_ref    : (1, Ce1+Ce3, HW) output, NCHW-flat
    xt = x_ref[0]                                               # (Cin, HW)
    hw = xt.shape[-1]

    # --- squeeze 1x1 conv + ReLU (MXU; channels stay on sublanes) ----------
    st = jnp.dot(wsq_ref[...], xt, preferred_element_type=jnp.float32)
    st = jnp.maximum(st + bsq_ref[...], 0.0)                    # (Csq, HW)

    # --- expand1x1 branch: 1x1 conv + ReLU, stored directly ----------------
    e1 = jnp.dot(we1_ref[...], st, preferred_element_type=jnp.float32)
    e1 = jnp.maximum(e1 + be1_ref[...], 0.0)                    # (Ce1, HW)
    o_ref[0, :ce1, :] = e1.astype(o_ref.dtype)

    # --- Dconv_shuffle expand3x3 branch -------------------------------------
    # (1) pixel shuffle applied ONCE to the tiny squeeze output (M = Csq):
    #     bf16 one-hot P upcast in-kernel -> the permutation is exact in f32.
    st_shuf = jnp.dot(st, pmat_ref[...].astype(jnp.float32),
                      preferred_element_type=jnp.float32)       # (Csq, HW)

    # (2) all nine 3x3 tap weights in ONE matmul (K = Csq).
    u3 = jnp.dot(we3_ref[...], st_shuf,
                 preferred_element_type=jnp.float32)            # (9*Ce3, HW)

    # (3) 3x3 taps as lane rolls (XLU slot) + boundary masks / accumulate (VPU).
    acc = jnp.zeros((ce3, hw), jnp.float32)
    for t in range(9):                                          # static unroll
        ky, kx = t // 3, t % 3
        off = (ky - 1) * W + (kx - 1)                           # flat src offset
        u_t = u3[t * ce3:(t + 1) * ce3]                         # sublane-aligned view
        if off != 0:
            # want out[:, p] = u_t[:, p + off]; wrapped lanes are masked below
            u_t = pltpu.roll(u_t, shift=(-off) % hw, axis=1)
        acc = acc + u_t * mask_ref[t]                           # (Ce3,HW)*(1,HW)

    e3 = jnp.maximum(acc + be3_ref[...], 0.0)                   # (Ce3, HW)
    o_ref[0, ce1:, :] = e3.astype(o_ref.dtype)


# ------------------------------- Wrapper -------------------------------------


def _make_perm_matrix(perm, HW):
    """P[q, p] = 1 iff perm[p] == q, so (s @ P)[:, p] = s[:, perm[p]]."""
    return jax.nn.one_hot(perm, HW, dtype=jnp.bfloat16).T       # (HW, HW) bf16


def _make_tap_masks(H, W):
    """(9, 1, HW) 0/1 masks: tap t=(ky,kx) is valid at output pixel p=(y,x) iff
    the (zero-padded) source pixel (y+ky-1, x+kx-1) is in bounds."""
    HW = H * W
    p = jnp.arange(HW)
    py, px = p // W, p % W
    masks = []
    for ky in range(3):
        for kx in range(3):
            sy = py + ky - 1
            sx = px + kx - 1
            valid = (sy >= 0) & (sy < H) & (sx >= 0) & (sx < W)
            masks.append(valid.astype(jnp.float32))
    return jnp.stack(masks, axis=0)[:, None, :]                 # (9, 1, HW)


def fire_shuffle_forward(x_nchw, params, perm):
    """Forward pass of Fire_Shuffle. x_nchw: (N, Cin, H, W) float32 (NCHW)."""
    w_sq, b_sq = params["w_sq"], params["b_sq"]                 # (Csq, Cin), (Csq,)
    w_e1, b_e1 = params["w_e1"], params["b_e1"]                 # (Ce1, Csq), (Ce1,)
    w_e3, b_e3 = params["w_e3"], params["b_e3"]                 # (Ce3, Csq, 3, 3), (Ce3,)

    N, Cin, H, W = x_nchw.shape
    HW = H * W
    Csq = w_sq.shape[0]
    Ce1 = w_e1.shape[0]
    Ce3 = w_e3.shape[0]
    Cout = Ce1 + Ce3

    # Free layout plumbing only: contiguous reshape + tiny weight repacking.
    x_flat = x_nchw.reshape(N, Cin, HW)
    w_e3_flat = jnp.concatenate(
        [w_e3[:, :, ky, kx] for ky in range(3) for kx in range(3)],
        axis=0)                                                 # (9*Ce3, Csq)
    b_sq_col = b_sq[:, None]                                    # (Csq, 1)
    b_e1_col = b_e1[:, None]                                    # (Ce1, 1)
    b_e3_col = b_e3[:, None]                                    # (Ce3, 1)
    p_mat = _make_perm_matrix(perm, HW)                         # (HW, HW) bf16
    masks = _make_tap_masks(H, W)                               # (9, 1, HW) f32

    kernel = functools.partial(_fire_shuffle_kernel, ce1=Ce1, ce3=Ce3, W=W)

    # NOTE: for large N one could fold several images per grid step (wider lane
    # panels) to amortize the ~0.35 us/step overhead; N=2 keeps both v7x cores busy.
    out_flat = pl.pallas_call(
        kernel,
        out_shape=jax.ShapeDtypeStruct((N, Cout, HW), jnp.float32),
        grid=(N,),
        in_specs=[
            pl.BlockSpec((1, Cin, HW), lambda n: (n, 0, 0)),
            pl.BlockSpec((Csq, Cin), lambda n: (0, 0)),
            pl.BlockSpec((Csq, 1), lambda n: (0, 0)),
            pl.BlockSpec((Ce1, Csq), lambda n: (0, 0)),
            pl.BlockSpec((Ce1, 1), lambda n: (0, 0)),
            pl.BlockSpec((9 * Ce3, Csq), lambda n: (0, 0)),
            pl.BlockSpec((Ce3, 1), lambda n: (0, 0)),
            pl.BlockSpec((HW, HW), lambda n: (0, 0)),
            pl.BlockSpec((9, 1, HW), lambda n: (0, 0, 0)),
        ],
        out_specs=pl.BlockSpec((1, Cout, HW), lambda n: (n, 0, 0)),
        compiler_params=pltpu.CompilerParams(
            dimension_semantics=("parallel",)),
    )(x_flat, w_sq, b_sq_col, w_e1, b_e1_col, w_e3_flat, b_e3_col, p_mat, masks)

    return out_flat.reshape(N, Cout, H, W)                      # NCHW, free reshape


# ------------------------- Pure-JAX reference (check) ------------------------


def fire_shuffle_reference(x_nchw, params, perm):
    N, Cin, H, W = x_nchw.shape
    hi = lax.Precision.HIGHEST
    s = jax.nn.relu(
        jnp.einsum("nchw,dc->ndhw", x_nchw, params["w_sq"], precision=hi)
        + params["b_sq"][None, :, None, None])
    e1 = jax.nn.relu(
        jnp.einsum("nchw,dc->ndhw", s, params["w_e1"], precision=hi)
        + params["b_e1"][None, :, None, None])
    Cs = s.shape[1]
    s_shuf = s.reshape(N, Cs, H * W)[:, :, perm].reshape(N, Cs, H, W)
    e3 = lax.conv_general_dilated(
        s_shuf, params["w_e3"], window_strides=(1, 1),
        padding=((1, 1), (1, 1)),
        dimension_numbers=("NCHW", "OIHW", "NCHW"), precision=hi)
    e3 = jax.nn.relu(e3 + params["b_e3"][None, :, None, None])
    return jnp.concatenate([e1, e3], axis=1)


# ---------------------------------- Main -------------------------------------


if __name__ == "__main__":
    # Fire_Shuffle config: inplanes=16, squeeze=4, expand1x1=8, expand3x3=8
    N, Cin, H, W = 2, 16, 16, 16
    Csq, Ce1, Ce3 = 4, 8, 8

    key = jax.random.PRNGKey(0)
    k = jax.random.split(key, 8)

    params = {
        "w_sq": jax.random.normal(k[0], (Csq, Cin), jnp.float32) * 0.1,
        "b_sq": jax.random.normal(k[1], (Csq,), jnp.float32) * 0.1,
        "w_e1": jax.random.normal(k[2], (Ce1, Csq), jnp.float32) * 0.1,
        "b_e1": jax.random.normal(k[3], (Ce1,), jnp.float32) * 0.1,
        "w_e3": jax.random.normal(k[4], (Ce3, Csq, 3, 3), jnp.float32) * 0.1,
        "b_e3": jax.random.normal(k[5], (Ce3,), jnp.float32) * 0.1,
    }
    # Fixed deterministic spatial-pixel permutation for the Dconv_shuffle branch.
    perm = jax.random.permutation(k[6], H * W)

    x = jax.random.normal(k[7], (N, Cin, H, W), jnp.float32)

    out = jax.block_until_ready(fire_shuffle_forward(x, params, perm))
    ref = fire_shuffle_reference(x, params, perm)

    assert out.shape == (N, Ce1 + Ce3, H, W), out.shape
    assert jnp.allclose(out, ref, rtol=1e-5, atol=1e-5), \
        float(jnp.max(jnp.abs(out - ref)))

    print("KERNEL_OK")
</pallas_src>

<mosaic_0001>
module attributes {stable_mosaic.version = 11 : i64} {
  func.func @_fire_shuffle_kernel(%arg0: i32, %arg1: memref<1x16x256xf32, #tpu.memory_space<vmem>>, %arg2: memref<4x16xf32, #tpu.memory_space<vmem>>, %arg3: memref<4x1xf32, #tpu.memory_space<vmem>>, %arg4: memref<8x4xf32, #tpu.memory_space<vmem>>, %arg5: memref<8x1xf32, #tpu.memory_space<vmem>>, %arg6: memref<72x4xf32, #tpu.memory_space<vmem>>, %arg7: memref<8x1xf32, #tpu.memory_space<vmem>>, %arg8: memref<256x256xbf16, #tpu.memory_space<vmem>>, %arg9: memref<9x1x256xf32, #tpu.memory_space<vmem>>, %arg10: memref<1x16x256xf32, #tpu.memory_space<vmem>>) attributes {dimension_semantics = [#tpu.dimension_semantics<parallel>], iteration_bounds = array<i64: 2>, scalar_prefetch = 0 : i64, scratch_operands = 0 : i64, tpu.core_type = #tpu.core_type<tc>, window_params = [{transform_indices = @transform_0, window_bounds = array<i64: 1, 16, 256>}, {pipeline_mode = #tpu.pipeline_mode<synchronous>, transform_indices = @transform_1, window_bounds = array<i64: 4, 16>}, {pipeline_mode = #tpu.pipeline_mode<synchronous>, transform_indices = @transform_2, window_bounds = array<i64: 4, 1>}, {pipeline_mode = #tpu.pipeline_mode<synchronous>, transform_indices = @transform_3, window_bounds = array<i64: 8, 4>}, {pipeline_mode = #tpu.pipeline_mode<synchronous>, transform_indices = @transform_4, window_bounds = array<i64: 8, 1>}, {pipeline_mode = #tpu.pipeline_mode<synchronous>, transform_indices = @transform_5, window_bounds = array<i64: 72, 4>}, {pipeline_mode = #tpu.pipeline_mode<synchronous>, transform_indices = @transform_6, window_bounds = array<i64: 8, 1>}, {pipeline_mode = #tpu.pipeline_mode<synchronous>, transform_indices = @transform_7, window_bounds = array<i64: 256, 256>}, {pipeline_mode = #tpu.pipeline_mode<synchronous>, transform_indices = @transform_8, window_bounds = array<i64: 9, 1, 256>}, {transform_indices = @transform_9, window_bounds = array<i64: 1, 16, 256>}]} {
    %c0 = arith.constant 0 : index
    %c0_0 = arith.constant 0 : index
    %c0_1 = arith.constant 0 : index
    %0 = vector.load %arg1[%c0, %c0_0, %c0_1] : memref<1x16x256xf32, #tpu.memory_space<vmem>>, vector<1x16x256xf32>
    %1 = vector.shape_cast %0 : vector<1x16x256xf32> to vector<16x256xf32>
    %c0_2 = arith.constant 0 : index
    %c0_3 = arith.constant 0 : index
    %2 = vector.load %arg2[%c0_2, %c0_3] : memref<4x16xf32, #tpu.memory_space<vmem>>, vector<4x16xf32>
    %cst = arith.constant dense<0.000000e+00> : vector<4x256xf32>
    %3 = tpu.matmul %2, %1, %cst {dimension_numbers = #tpu.dot_dimension_numbers<[1], [0], [0], [1], [0, 0, 1, 1], [], []>} : vector<4x16xf32>, vector<16x256xf32>, vector<4x256xf32> -> vector<4x256xf32>
    %c0_4 = arith.constant 0 : index
    %c0_5 = arith.constant 0 : index
    %4 = vector.load %arg3[%c0_4, %c0_5] : memref<4x1xf32, #tpu.memory_space<vmem>>, vector<4x1xf32>
    %5 = vector.broadcast %4 : vector<4x1xf32> to vector<4x256xf32>
    %6 = arith.addf %3, %5 : vector<4x256xf32>
    %cst_6 = arith.constant 0.000000e+00 : f32
    %7 = vector.broadcast %cst_6 : f32 to vector<4x256xf32>
    %8 = arith.maximumf %6, %7 : vector<4x256xf32>
    %c0_7 = arith.constant 0 : index
    %c0_8 = arith.constant 0 : index
    %9 = vector.load %arg4[%c0_7, %c0_8] : memref<8x4xf32, #tpu.memory_space<vmem>>, vector<8x4xf32>
    %cst_9 = arith.constant dense<0.000000e+00> : vector<8x256xf32>
    %10 = tpu.matmul %9, %8, %cst_9 {dimension_numbers = #tpu.dot_dimension_numbers<[1], [0], [0], [1], [0, 0, 1, 1], [], []>} : vector<8x4xf32>, vector<4x256xf32>, vector<8x256xf32> -> vector<8x256xf32>
    %c0_10 = arith.constant 0 : index
    %c0_11 = arith.constant 0 : index
    %11 = vector.load %arg5[%c0_10, %c0_11] : memref<8x1xf32, #tpu.memory_space<vmem>>, vector<8x1xf32>
    %12 = vector.broadcast %11 : vector<8x1xf32> to vector<8x256xf32>
    %13 = arith.addf %10, %12 : vector<8x256xf32>
    %cst_12 = arith.constant 0.000000e+00 : f32
    %14 = vector.broadcast %cst_12 : f32 to vector<8x256xf32>
    %15 = arith.maximumf %13, %14 : vector<8x256xf32>
    %c0_13 = arith.constant 0 : index
    %c0_14 = arith.constant 0 : index
    %c0_15 = arith.constant 0 : index
    %16 = vector.load %arg10[%c0_13, %c0_14, %c0_15] : memref<1x16x256xf32, #tpu.memory_space<vmem>>, vector<1x8x256xf32>
    %17 = vector.shape_cast %16 : vector<1x8x256xf32> to vector<8x256xf32>
    %18 = vector.shape_cast %15 : vector<8x256xf32> to vector<1x8x256xf32>
    tpu.vector_store %arg10[%c0_13, %c0_14, %c0_15], %18 {strides = array<i32>} : memref<1x16x256xf32, #tpu.memory_space<vmem>>, vector<1x8x256xf32>,
    %c0_16 = arith.constant 0 : index
    %c0_17 = arith.constant 0 : index
    %19 = vector.load %arg8[%c0_16, %c0_17] : memref<256x256xbf16, #tpu.memory_space<vmem>>, vector<256x256xbf16>
    %20 = arith.extf %19 : vector<256x256xbf16> to vector<256x256xf32>
    %cst_18 = arith.constant dense<0.000000e+00> : vector<4x256xf32>
    %21 = tpu.matmul %8, %20, %cst_18 {dimension_numbers = #tpu.dot_dimension_numbers<[1], [0], [0], [1], [0, 0, 1, 1], [], []>} : vector<4x256xf32>, vector<256x256xf32>, vector<4x256xf32> -> vector<4x256xf32>
    %c0_19 = arith.constant 0 : index
    %c0_20 = arith.constant 0 : index
    %22 = vector.load %arg6[%c0_19, %c0_20] : memref<72x4xf32, #tpu.memory_space<vmem>>, vector<72x4xf32>
    %cst_21 = arith.constant dense<0.000000e+00> : vector<72x256xf32>
    %23 = tpu.matmul %22, %21, %cst_21 {dimension_numbers = #tpu.dot_dimension_numbers<[1], [0], [0], [1], [0, 0, 1, 1], [], []>} : vector<72x4xf32>, vector<4x256xf32>, vector<72x256xf32> -> vector<72x256xf32>
    %cst_22 = arith.constant 0.000000e+00 : f32
    %24 = vector.broadcast %cst_22 : f32 to vector<8x256xf32>
    %25 = vector.extract_strided_slice %23 {offsets = [0, 0], sizes = [8, 256], strides = [1, 1]} : vector<72x256xf32> to vector<8x256xf32>
    %c17_i32 = arith.constant 17 : i32
    %26 = tpu.dynamic_rotate %25 by %c17_i32 dim 1 : vector<8x256xf32>, i32 -> vector<8x256xf32>
    %c0_23 = arith.constant 0 : index
    %c0_24 = arith.constant 0 : index
    %c0_25 = arith.constant 0 : index
    %27 = vector.load %arg9[%c0_23, %c0_24, %c0_25] : memref<9x1x256xf32, #tpu.memory_space<vmem>>, vector<1x1x256xf32>
    %28 = vector.shape_cast %27 : vector<1x1x256xf32> to vector<1x256xf32>
    %29 = vector.broadcast %28 : vector<1x256xf32> to vector<8x256xf32>
    %30 = arith.mulf %26, %29 : vector<8x256xf32>
    %31 = arith.addf %24, %30 : vector<8x256xf32>
    %32 = vector.extract_strided_slice %23 {offsets = [8, 0], sizes = [8, 256], strides = [1, 1]} : vector<72x256xf32> to vector<8x256xf32>
    %c16_i32 = arith.constant 16 : i32
    %33 = tpu.dynamic_rotate %32 by %c16_i32 dim 1 : vector<8x256xf32>, i32 -> vector<8x256xf32>
    %c1 = arith.constant 1 : index
    %c0_26 = arith.constant 0 : index
    %c0_27 = arith.constant 0 : index
    %34 = vector.load %arg9[%c1, %c0_26, %c0_27] : memref<9x1x256xf32, #tpu.memory_space<vmem>>, vector<1x1x256xf32>
    %35 = vector.shape_cast %34 : vector<1x1x256xf32> to vector<1x256xf32>
    %36 = vector.broadcast %35 : vector<1x256xf32> to vector<8x256xf32>
    %37 = arith.mulf %33, %36 : vector<8x256xf32>
    %38 = arith.addf %31, %37 : vector<8x256xf32>
    %39 = vector.extract_strided_slice %23 {offsets = [16, 0], sizes = [8, 256], strides = [1, 1]} : vector<72x256xf32> to vector<8x256xf32>
    %c15_i32 = arith.constant 15 : i32
    %40 = tpu.dynamic_rotate %39 by %c15_i32 dim 1 : vector<8x256xf32>, i32 -> vector<8x256xf32>
    %c2 = arith.constant 2 : index
    %c0_28 = arith.constant 0 : index
    %c0_29 = arith.constant 0 : index
    %41 = vector.load %arg9[%c2, %c0_28, %c0_29] : memref<9x1x256xf32, #tpu.memory_space<vmem>>, vector<1x1x256xf32>
    %42 = vector.shape_cast %41 : vector<1x1x256xf32> to vector<1x256xf32>
    %43 = vector.broadcast %42 : vector<1x256xf32> to vector<8x256xf32>
    %44 = arith.mulf %40, %43 : vector<8x256xf32>
    %45 = arith.addf %38, %44 : vector<8x256xf32>
    %46 = vector.extract_strided_slice %23 {offsets = [24, 0], sizes = [8, 256], strides = [1, 1]} : vector<72x256xf32> to vector<8x256xf32>
    %c1_i32 = arith.constant 1 : i32
    %47 = tpu.dynamic_rotate %46 by %c1_i32 dim 1 : vector<8x256xf32>, i32 -> vector<8x256xf32>
    %c3 = arith.constant 3 : index
    %c0_30 = arith.constant 0 : index
    %c0_31 = arith.constant 0 : index
    %48 = vector.load %arg9[%c3, %c0_30, %c0_31] : memref<9x1x256xf32, #tpu.memory_space<vmem>>, vector<1x1x256xf32>
    %49 = vector.shape_cast %48 : vector<1x1x256xf32> to vector<1x256xf32>
    %50 = vector.broadcast %49 : vector<1x256xf32> to vector<8x256xf32>
    %51 = arith.mulf %47, %50 : vector<8x256xf32>
    %52 = arith.addf %45, %51 : vector<8x256xf32>
    %53 = vector.extract_strided_slice %23 {offsets = [32, 0], sizes = [8, 256], strides = [1, 1]} : vector<72x256xf32> to vector<8x256xf32>
    %c4 = arith.constant 4 : index
    %c0_32 = arith.constant 0 : index
    %c0_33 = arith.constant 0 : index
    %54 = vector.load %arg9[%c4, %c0_32, %c0_33] : memref<9x1x256xf32, #tpu.memory_space<vmem>>, vector<1x1x256xf32>
    %55 = vector.shape_cast %54 : vector<1x1x256xf32> to vector<1x256xf32>
    %56 = vector.broadcast %55 : vector<1x256xf32> to vector<8x256xf32>
    %57 = arith.mulf %53, %56 : vector<8x256xf32>
    %58 = arith.addf %52, %57 : vector<8x256xf32>
    %59 = vector.extract_strided_slice %23 {offsets = [40, 0], sizes = [8, 256], strides = [1, 1]} : vector<72x256xf32> to vector<8x256xf32>
    %c255_i32 = arith.constant 255 : i32
    %60 = tpu.dynamic_rotate %59 by %c255_i32 dim 1 : vector<8x256xf32>, i32 -> vector<8x256xf32>
    %c5 = arith.constant 5 : index
    %c0_34 = arith.constant 0 : index
    %c0_35 = arith.constant 0 : index
    %61 = vector.load %arg9[%c5, %c0_34, %c0_35] : memref<9x1x256xf32, #tpu.memory_space<vmem>>, vector<1x1x256xf32>
    %62 = vector.shape_cast %61 : vector<1x1x256xf32> to vector<1x256xf32>
    %63 = vector.broadcast %62 : vector<1x256xf32> to vector<8x256xf32>
    %64 = arith.mulf %60, %63 : vector<8x256xf32>
    %65 = arith.addf %58, %64 : vector<8x256xf32>
    %66 = vector.extract_strided_slice %23 {offsets = [48, 0], sizes = [8, 256], strides = [1, 1]} : vector<72x256xf32> to vector<8x256xf32>
    %c241_i32 = arith.constant 241 : i32
    %67 = tpu.dynamic_rotate %66 by %c241_i32 dim 1 : vector<8x256xf32>, i32 -> vector<8x256xf32>
    %c6 = arith.constant 6 : index
    %c0_36 = arith.constant 0 : index
    %c0_37 = arith.constant 0 : index
    %68 = vector.load %arg9[%c6, %c0_36, %c0_37] : memref<9x1x256xf32, #tpu.memory_space<vmem>>, vector<1x1x256xf32>
    %69 = vector.shape_cast %68 : vector<1x1x256xf32> to vector<1x256xf32>
    %70 = vector.broadcast %69 : vector<1x256xf32> to vector<8x256xf32>
    %71 = arith.mulf %67, %70 : vector<8x256xf32>
    %72 = arith.addf %65, %71 : vector<8x256xf32>
    %73 = vector.extract_strided_slice %23 {offsets = [56, 0], sizes = [8, 256], strides = [1, 1]} : vector<72x256xf32> to vector<8x256xf32>
    %c240_i32 = arith.constant 240 : i32
    %74 = tpu.dynamic_rotate %73 by %c240_i32 dim 1 : vector<8x256xf32>, i32 -> vector<8x256xf32>
    %c7 = arith.constant 7 : index
    %c0_38 = arith.constant 0 : index
    %c0_39 = arith.constant 0 : index
    %75 = vector.load %arg9[%c7, %c0_38, %c0_39] : memref<9x1x256xf32, #tpu.memory_space<vmem>>, vector<1x1x256xf32>
    %76 = vector.shape_cast %75 : vector<1x1x256xf32> to vector<1x256xf32>
    %77 = vector.broadcast %76 : vector<1x256xf32> to vector<8x256xf32>
    %78 = arith.mulf %74, %77 : vector<8x256xf32>
    %79 = arith.addf %72, %78 : vector<8x256xf32>
    %80 = vector.extract_strided_slice %23 {offsets = [64, 0], sizes = [8, 256], strides = [1, 1]} : vector<72x256xf32> to vector<8x256xf32>
    %c239_i32 = arith.constant 239 : i32
    %81 = tpu.dynamic_rotate %80 by %c239_i32 dim 1 : vector<8x256xf32>, i32 -> vector<8x256xf32>
    %c8 = arith.constant 8 : index
    %c0_40 = arith.constant 0 : index
    %c0_41 = arith.constant 0 : index
    %82 = vector.load %arg9[%c8, %c0_40, %c0_41] : memref<9x1x256xf32, #tpu.memory_space<vmem>>, vector<1x1x256xf32>
    %83 = vector.shape_cast %82 : vector<1x1x256xf32> to vector<1x256xf32>
    %84 = vector.broadcast %83 : vector<1x256xf32> to vector<8x256xf32>
    %85 = arith.mulf %81, %84 : vector<8x256xf32>
    %86 = arith.addf %79, %85 : vector<8x256xf32>
    %c0_42 = arith.constant 0 : index
    %c0_43 = arith.constant 0 : index
    %87 = vector.load %arg7[%c0_42, %c0_43] : memref<8x1xf32, #tpu.memory_space<vmem>>, vector<8x1xf32>
    %88 = vector.broadcast %87 : vector<8x1xf32> to vector<8x256xf32>
    %89 = arith.addf %86, %88 : vector<8x256xf32>
    %cst_44 = arith.constant 0.000000e+00 : f32
    %90 = vector.broadcast %cst_44 : f32 to vector<8x256xf32>
    %91 = arith.maximumf %89, %90 : vector<8x256xf32>
    %c0_45 = arith.constant 0 : index
    %c8_46 = arith.constant 8 : index
    %c0_47 = arith.constant 0 : index
    %92 = vector.load %arg10[%c0_45, %c8_46, %c0_47] : memref<1x16x256xf32, #tpu.memory_space<vmem>>, vector<1x8x256xf32>
    %93 = vector.shape_cast %92 : vector<1x8x256xf32> to vector<8x256xf32>
    %94 = vector.shape_cast %91 : vector<8x256xf32> to vector<1x8x256xf32>
    tpu.vector_store %arg10[%c0_45, %c8_46, %c0_47], %94 {strides = array<i32>} : memref<1x16x256xf32, #tpu.memory_space<vmem>>, vector<1x8x256xf32>,
    return
  }
  func.func @transform_0(%arg0: i32) -> (i32, i32, i32) {
    %c0_i32 = arith.constant 0 : i32
    %c0_i32_0 = arith.constant 0 : i32
    %c0_i32_1 = arith.constant 0 : i32
    return %arg0, %c0_i32, %c0_i32_0 : i32, i32, i32
  }
  func.func @transform_1(%arg0: i32) -> (i32, i32) {
    %c0_i32 = arith.constant 0 : i32
    %c0_i32_0 = arith.constant 0 : i32
    %c0_i32_1 = arith.constant 0 : i32
    return %c0_i32, %c0_i32_0 : i32, i32
  }
  func.func @transform_2(%arg0: i32) -> (i32, i32) {
    %c0_i32 = arith.constant 0 : i32
    %c0_i32_0 = arith.constant 0 : i32
    %c0_i32_1 = arith.constant 0 : i32
    return %c0_i32, %c0_i32_0 : i32, i32
  }
  func.func @transform_3(%arg0: i32) -> (i32, i32) {
    %c0_i32 = arith.constant 0 : i32
    %c0_i32_0 = arith.constant 0 : i32
    %c0_i32_1 = arith.constant 0 : i32
    return %c0_i32, %c0_i32_0 : i32, i32
  }
  func.func @transform_4(%arg0: i32) -> (i32, i32) {
    %c0_i32 = arith.constant 0 : i32
    %c0_i32_0 = arith.constant 0 : i32
    %c0_i32_1 = arith.constant 0 : i32
    return %c0_i32, %c0_i32_0 : i32, i32
  }
  func.func @transform_5(%arg0: i32) -> (i32, i32) {
    %c0_i32 = arith.constant 0 : i32
    %c0_i32_0 = arith.constant 0 : i32
    %c0_i32_1 = arith.constant 0 : i32
    return %c0_i32, %c0_i32_0 : i32, i32
  }
  func.func @transform_6(%arg0: i32) -> (i32, i32) {
    %c0_i32 = arith.constant 0 : i32
    %c0_i32_0 = arith.constant 0 : i32
    %c0_i32_1 = arith.constant 0 : i32
    return %c0_i32, %c0_i32_0 : i32, i32
  }
  func.func @transform_7(%arg0: i32) -> (i32, i32) {
    %c0_i32 = arith.constant 0 : i32
    %c0_i32_0 = arith.constant 0 : i32
    %c0_i32_1 = arith.constant 0 : i32
    return %c0_i32, %c0_i32_0 : i32, i32
  }
  func.func @transform_8(%arg0: i32) -> (i32, i32, i32) {
    %c0_i32 = arith.constant 0 : i32
    %c0_i32_0 = arith.constant 0 : i32
    %c0_i32_1 = arith.constant 0 : i32
    %c0_i32_2 = arith.constant 0 : i32
    return %c0_i32, %c0_i32_0, %c0_i32_1 : i32, i32, i32
  }
  func.func @transform_9(%arg0: i32) -> (i32, i32, i32) {
    %c0_i32 = arith.constant 0 : i32
    %c0_i32_0 = arith.constant 0 : i32
    %c0_i32_1 = arith.constant 0 : i32
    return %arg0, %c0_i32, %c0_i32_0 : i32, i32, i32
  }
}

</mosaic_0001>

<bundles_post_ra>
// kernel: tpu_custom_call.1
= control target key start
LH: loop header
LB: loop body
LE: loop exit
PB: predicated region body
PF: predicated region fallthrough
CT: control target
= control target key end

     0   :  { %14 = vsyncpa [#allocation3], 0  ;;  %s1878_s0 = inlined_call_operand.vmem [shape: f32[2,16,256], index: 0, kind: input, shape index: {}]   ;;  %s1879_s1 = inlined_call_operand.vmem [shape: f32[4,16], index: 1, kind: input, shape index: {}]   ;;  %s1880_s2 = inlined_call_operand.vmem [shape: f32[4,1], index: 2, kind: input, shape index: {}]   ;;  %s1881_s3 = inlined_call_operand.vmem [shape: f32[8,4], index: 3, kind: input, shape index: {}]   ;;  %s1882_s4 = inlined_call_operand.vmem [shape: f32[8,1], index: 4, kind: input, shape index: {}]   ;;  %s1883_s5 = inlined_call_operand.vmem [shape: f32[72,4], index: 5, kind: input, shape index: {}]   ;;  %s1884_s6 = inlined_call_operand.vmem [shape: f32[8,1], index: 6, kind: input, shape index: {}]   ;;  %s1885_s7 = inlined_call_operand.hbm [shape: bf16[256,256], index: 7, kind: input, shape index: {}]   ;;  %s1886_s8 = inlined_call_operand.vmem [shape: f32[9,1,256], index: 8, kind: input, shape index: {}]   ;;  %s1887_s9 = inlined_call_operand.hbm [shape: f32[2,16,256], index: 9, kind: output, shape index: {}]  }
   0x1   :  { %15 = vsyncpa [#allocation4], 0 }
   0x2   :  { %17 = vsyncpa [#allocation4 + $0x1], 0  ;;  %s1578_s30 = smov 0   ;;  %s1580_s10 = smov 0  }
   0x3   :  { %s1582_s11 = smov 0   ;;  %s1584_s12 = smov 0  }
   0x4 LB: > { %s1599_s13 = sadd.s32 4294967295, %s1511_s12   ;;  %s1165_s14 = sadd.s32 4294967294, %s1511_s12   ;;  %s1511_s12 = sphi %s1584_s12, %s1903_s12   ;;  %s1507_s11 = sphi %s1582_s11, %s1902_s11   ;;  %s1503_s10 = sphi %s1580_s10, %s1901_s10   ;;  %s1499_s30 = sphi %s1578_s30, %s1900_s30  }
   0x5   : > { %s1603_s15 = sadd.s32 1, %s1511_s12   ;;  %s224_s16 = sadd.s32 1, %s1507_s11 }
   0x6   : > { %s221_s17 = ssub.s32 %s1511_s12, %s1603_s15  ;;  %p234_p0 = scmp.ne.s32.totalorder %s1507_s11, %s1503_s10 }
   0x7   : > { %p222_p1 = scmp.eq.s32.totalorder %s221_s17, 0  ;;  %p235_p2 = scmp.eq.s32.totalorder %s1599_s13, 1 }
   0x8   : > { %p240_p3 = scmp.ne.s32.totalorder %s1503_s10, %s1499_s30  ;;  %p241_p4 = scmp.eq.s32.totalorder %s1165_s14, 1 }
   0x9   : > { %s1614_s18 = scalar_select %p222_p1, %s1507_s11, %s224_s16  }
   0xa   : > { %p1616_p5 = por %p235_p2, %p234_p0  ;;  %p1620_p6 = por %p241_p4, %p240_p3 }
   0xb   : > { %p1166_p7 = scmp.ge.s32.totalorder %s1511_s12, 1  ;;  %p248_p8 = scmp.lt.s32.totalorder %s1511_s12, 3 }
   0xc   : > { %s1891_s19 = scalar_select %p1616_p5, 1, 0 }
   0xd   : > { %s1892_s20 = scalar_select %p1620_p6, 1, 0 }
   0xe   : > { %p1888_p9 = scmp.eq.s32.totalorder %s1599_s13, 0  ;;  %p1627_p10 = pnand %p1166_p7, %p248_p8 }
   0xf   : > { %s1513_s22 = smov [#allocation2]   ;;  %s1417_s27 = scalar_lea.hbm %s1885_s7, 4096 }
  0x10   : > { %s1893_s21 = scalar_select %p1627_p10, 1, 0 }
  0x11   : > { %s278_s23 = sshll.u32 %s1513_s22, 4  ;;  %p1310_p11 = pneg %p1627_p10  ;;  %s279_s23 = int_to_ptr.vmem [resolvable:$true] %s278_s23 }
  0x12   : > { %p1418_p13 = scmp.ne.s32.totalorder %s1885_s7, %s1417_s27  ;;  %p1424_p3 = scmp.lt.u32.totalorder %s1417_s27, %s1885_s7 }
  0x13   : > { %p1635_p12 = pnand %p1888_p9, %p1310_p11 }
  0x15   : > { %p1419_p0 = pneg %p1635_p12 }
  0x17   : > { %p1420_p1 = pnand %p1419_p0, %p1418_p13 }
  0x19   : > { %p1421_p2 = pneg %p1420_p1 }
  0x1b   : > { %p1426_p4 = pnand %p1424_p3, %p1421_p2 }
  0x1d   : > { %1429 = shalt.err (!%p1426_p4)
}
  0x1e   : > { %s1430_s17 = scalar_lea.vmem %s279_s23, 4096  ;;  %p1438_p9 = scmp.lt.s32.totalorder %s279_s23, %s279_s23 }
  0x1f   : > { %p1431_p7 = scmp.ne.s32.totalorder %s279_s23, %s1430_s17  ;;  %p1439_p6 = scmp.lt.s32.totalorder %s1430_s17, %s1430_s17 }
  0x21   : > { %p1433_p8 = pnand %p1431_p7, %p1419_p0  ;;  %p1440_p5 = por %p1439_p6, %p1438_p9 }
  0x23   : > { %p1434_p11 = pneg %p1433_p8 }
  0x25   : > { %p1441_p10 = pnand %p1440_p5, %p1434_p11 }
  0x27   : > { %1444 = shalt.err (!%p1441_p10)
}
  0x28   : > { %s1514_s22 = smov 128   ;;  %s1515_s25 = smov 8  }
  0x29   : > { %1313 = dma.hbm_to_vmem [thread:$0]  (!%p1635_p12), %s1885_s7, 4096, %s279_s23, [#allocation3], %s1514_s22, %s1514_s22, %s1515_s25  }
  0x2a   : > { %p1895_p13 = scmp.ne.s32.totalorder %s1893_s21, 0 }
  0x2b   : > { %p1896_p1 = scmp.eq.s32.totalorder (!%p1895_p13), %s1599_s13, 0 }
  0x2c   : > { %305 = sbr.rel (%p1895_p13) target bundleno = 882 (0x372), region = 56 }
  0x33   : > { %1490 = dma.done.wait (%p1896_p1), [#allocation3], 4096   ;;  %p1897_p0 = pmov %p1896_p1 }
  0x34   : > { %p341_p5 = scmp.lt.s32.totalorder %s1599_s13, 1  ;;  %v1516_v0 = vmov 0.0   ;;  %v1517_v1 = vmov 0   ;;  %v351_v7 = vld [vmem:[%s1880_s2] sm:$0xf]  ;;  %vm357_vm0 = vcmask 130048  }
  0x35   : > { %1492 = vsyncadd (%p1897_p0), [#allocation3], 4294963200  ;;  %425 = vmatprep.mubr.f32.mxu0 %v1516_v0  ;;  %1367 = vset.pattern.permute.xlu0 %v1517_v1  ;;  %v1065_v9 = vld [vmem:[%s1884_s6] sm:$0xff]  ;;  %v1372_v13 = vld [vmem:[#allocation2 + $0x14] ss:$8 sps:$4 sm:$0xff]   ;;  %vm445_vm1 = vcmask 1043456  }
  0x36   : > { %s342_s24 = scalar_select %p341_p5, %s1599_s13, 1  ;;  %1368 = vset.pattern.permute.xlu1 %v1517_v1  ;;  %354 = vperm.xlu0 %1367, %v351_v7   ;;  %v1369_v10 = vld [vmem:[#allocation2 + $0x4] ss:$8 sps:$4 sm:$0xff]   ;;  %v1371_v11 = vld [vmem:[#allocation2] ss:$8 sps:$4 sm:$0xff]   ;;  %vm441_vm2 = vcmask 31744  }
  0x37   : > { %v350_v12 = vld [vmem:[%s1879_s1] sm:$0xf]  ;;  %1209 = vmatprep.subr.bf16.mxu1 %v1369_v10  ;;  %v1374_v14 = vld [vmem:[#allocation2 + $0x10] ss:$8 sps:$4 sm:$0xff]   ;;  %v1375_v15 = vld [vmem:[#allocation2 + $0x24] ss:$8 sps:$4 sm:$0xff]  }
  0x38   : > { %s1202_s23 = sshll.u32 %s342_s24, 5  ;;  %1211 = vmatpush1.bf16.msra.mxu1 %v1371_v11  ;;  %v1377_v16 = vld [vmem:[#allocation2 + $0x20] ss:$8 sps:$4 sm:$0xff]   ;;  %v1378_v17 = vld [vmem:[#allocation2 + $0x34] ss:$8 sps:$4 sm:$0xff]   ;;  %s338_s17 = sand.u32 1, %s1503_s10  }
  0x39   : > { %s345_s29 = scalar_lea.vmem %s1878_s0, %s1202_s23  ;;  %1213 = vmatprep.subr.bf16.mxu1 %v1372_v13  ;;  %v1380_v18 = vld [vmem:[#allocation2 + $0x30] ss:$8 sps:$4 sm:$0xff]   ;;  %v1381_v19 = vld [vmem:[#allocation2 + $0x44] ss:$8 sps:$4 sm:$0xff]   ;;  %v1383_v20 = vld [vmem:[#allocation2 + $0x40] ss:$8 sps:$4 sm:$0xff]  }
  0x3a   : > { %v347_v2 = vld [vmem:[%s345_s29 + $0x8] sm:$0xff]  ;;  %v349_v3 = vld [vmem:[%s345_s29 + $0x18] sm:$0xff]  ;;  %v346_v4 = vld [vmem:[%s345_s29] sm:$0xff]  ;;  %1068 = vperm.xlu0 %1367, %v1065_v9   ;;  %s1171_s26 = sshll.u32 %s338_s17, 5  ;;  %s1518_s24 = smov 17  }
  0x3b   : > { %v1204_v5 = vpack.c.bf16 %v349_v3, %v347_v2  ;;  %v348_v6 = vld [vmem:[%s345_s29 + $0x10] sm:$0xff]  ;;  %v1387_v23 = vld [vmem:[#allocation2 + $0x64] ss:$8 sps:$4 sm:$0xff]   ;;  %v1389_v24 = vld [vmem:[#allocation2 + $0x60] ss:$8 sps:$4 sm:$0xff]   ;;  %s1736_s28 = scalar_lea.vmem [#allocation5], %s1171_s26 }
  0x3c   : > { %v1206_v8 = vpack.c.bf16 %v348_v6, %v346_v4  ;;  %1215 = vmatpush1.bf16.msra.mxu1 %v1374_v14  ;;  %v1384_v21 = vld [vmem:[#allocation2 + $0x54] ss:$8 sps:$4 sm:$0xff]   ;;  %v1386_v22 = vld [vmem:[#allocation2 + $0x50] ss:$8 sps:$4 sm:$0xff]   ;;  %v1393_v27 = vld [vmem:[#allocation2 + $0x84] ss:$8 sps:$4 sm:$0xff]  }
  0x3d   : > { %1205 = vmatprep.subr.bf16.mxu0 %v1204_v5  ;;  %1217 = vmatprep.subr.bf16.mxu1 %v1375_v15  ;;  %v1390_v25 = vld [vmem:[#allocation2 + $0x74] ss:$8 sps:$4 sm:$0xff]   ;;  %v1392_v26 = vld [vmem:[#allocation2 + $0x70] ss:$8 sps:$4 sm:$0xff]   ;;  %v1395_v28 = vld [vmem:[#allocation2 + $0x80] ss:$8 sps:$4 sm:$0xff]  }
  0x3e   : > { %1207 = vmatpush1.bf16.msra.mxu0 %v1206_v8  ;;  %v1396_v29 = vld [vmem:[#allocation2 + $0x94] ss:$8 sps:$4 sm:$0xff]   ;;  %v1398_v30 = vld [vmem:[#allocation2 + $0x90] ss:$8 sps:$4 sm:$0xff]   ;;  %v1399_v31 = vld [vmem:[#allocation2 + $0xa4] ss:$8 sps:$4 sm:$0xff]  }
  0x3f   : > { %v1401_v32 = vld [vmem:[#allocation2 + $0xa0] ss:$8 sps:$4 sm:$0xff]   ;;  %v1402_v33 = vld [vmem:[#allocation2 + $0xb4] ss:$8 sps:$4 sm:$0xff]   ;;  %v1404_v34 = vld [vmem:[#allocation2 + $0xb0] ss:$8 sps:$4 sm:$0xff]  }
  0x40   : > { %1219 = vmatpush1.bf16.msra.mxu1 %v1377_v16  ;;  %v1405_v35 = vld [vmem:[#allocation2 + $0xc4] ss:$8 sps:$4 sm:$0xff]   ;;  %v1407_v36 = vld [vmem:[#allocation2 + $0xc0] ss:$8 sps:$4 sm:$0xff]   ;;  %v1408_v37 = vld [vmem:[#allocation2 + $0xd4] ss:$8 sps:$4 sm:$0xff]  }
  0x41   : > { %1174 = vmatmul.mubr.msk.f32.vlgmr.msra.gmra.mrb[0].mxu0 %vm357_vm0, %v350_v12  ;;  %1221 = vmatprep.subr.bf16.mxu1 %v1378_v17  ;;  %v1410_v38 = vld [vmem:[#allocation2 + $0xd0] ss:$8 sps:$4 sm:$0xff]   ;;  %v1411_v39 = vld [vmem:[#allocation2 + $0xe4] ss:$8 sps:$4 sm:$0xff]   ;;  %v1413_v40 = vld [vmem:[#allocation2 + $0xe0] ss:$8 sps:$4 sm:$0xff]  }
  0x42   : > { %516 = vmatprep.mubr.f32.mxu0 %v1516_v0  ;;  %v1414_v41 = vld [vmem:[#allocation2 + $0xf4] ss:$8 sps:$4 sm:$0xff]   ;;  %v1416_v42 = vld [vmem:[#allocation2 + $0xf0] ss:$8 sps:$4 sm:$0xff]   ;;  %v434_v50 = vld [vmem:[%s1881_s3] sm:$0xff]  ;;  %s1519_s23 = smov 16  }
  0x43   : > { %v435_v51 = vld [vmem:[%s1882_s4] sm:$0xff]  ;;  %v695_v57 = vld [vmem:[%s1883_s5 + $0x8] sm:$0xff]  ;;  %v696_v58 = vld [vmem:[%s1883_s5 + $0x10] sm:$0xff]  ;;  %s1520_s27 = smov 15   ;;  %s1521_s21 = smov 1  }
  0x44   : > { %1223 = vmatpush1.bf16.msra.mxu1 %v1380_v18  ;;  %438 = vperm.xlu1 %1368, %v435_v51   ;;  %v694_v54 = vld [vmem:[%s1883_s5] sm:$0xff]  ;;  %v697_v59 = vld [vmem:[%s1883_s5 + $0x18] sm:$0xff]  ;;  %v699_v61 = vld [vmem:[%s1883_s5 + $0x28] sm:$0xff]  ;;  %s1522_s29 = smov 127   ;;  %s1523_s14 = smov 113  }
  0x45   : > { %1225 = vmatprep.subr.bf16.mxu1 %v1381_v19  ;;  %v698_v60 = vld [vmem:[%s1883_s5 + $0x20] sm:$0xff]  ;;  %v700_v62 = vld [vmem:[%s1883_s5 + $0x30] sm:$0xff]  ;;  %v701_v63 = vld [vmem:[%s1883_s5 + $0x38] sm:$0xff]  ;;  %s1524_s16 = smov 112   ;;  %s1525_s22 = smov 111  }
  0x46   : > { %v702_v1 = vld [vmem:[%s1883_s5 + $0x40] sm:$0xff]  ;;  %s1091_s25 = sshll.u32 %s1736_s28, 4  ;;  %s1203_s26 = sshll.u32 %s1599_s13, 9  ;;  %s1825_s25 = int_to_ptr.vmem [resolvable:$true] %s1091_s25 }
  0x47   : > { %s1836_s13 = scalar_lea.sflag [#allocation4], %s338_s17  ;;  %p1898_p9 = scmp.ne.s32.totalorder %s1891_s19, 0 }
  0x48   : > { %1227 = vmatpush1.bf16.msra.mxu1 %v1383_v20 }
  0x49   : > { %1229 = vmatprep.subr.bf16.mxu1 %v1384_v21 }
  0x4c   : > { %1231 = vmatpush1.bf16.msra.mxu1 %v1386_v22 }
  0x4d   : > { %1233 = vmatprep.subr.bf16.mxu1 %v1387_v23 }
  0x50   : > { %1235 = vmatpush1.bf16.msra.mxu1 %v1389_v24 }
  0x51   : > { %1237 = vmatprep.subr.bf16.mxu1 %v1390_v25 }
  0x54   : > { %1239 = vmatpush1.bf16.msra.mxu1 %v1392_v26 }
  0x55   : > { %1241 = vmatprep.subr.bf16.mxu1 %v1393_v27  ;;  %v859_v27 = vlaneseq }
  0x58   : > { %1243 = vmatpush1.bf16.msra.mxu1 %v1395_v28 }
  0x59   : > { %1245 = vmatprep.subr.bf16.mxu1 %v1396_v29 }
  0x5c   : > { %1247 = vmatpush1.bf16.msra.mxu1 %v1398_v30  ;;  %v867_v30 = vshrl.u32 %v859_v27, 7 }
  0x5d   : > { %1249 = vmatprep.subr.bf16.mxu1 %v1399_v31  ;;  %v1748_v31 = vand.u32 127, %v859_v27 }
  0x5f   : > { %vm884_vm3 = vcmp.lt.s32.totalorder %v1748_v31, 16  ;;  %vm861_vm4 = vcmp.lt.s32.totalorder %v1748_v31, 17  ;;  %vm908_vm5 = vcmp.lt.s32.totalorder %v1748_v31, 15  ;;  %vm932_vm6 = vcmp.lt.s32.totalorder %v1748_v31, 1 }
  0x60   : > { %1251 = vmatpush1.bf16.msra.mxu1 %v1401_v32  ;;  %vm973_vm7 = vcmp.lt.s32.totalorder %v1748_v31, 127  ;;  %vm997_vm8 = vcmp.lt.s32.totalorder %v1748_v31, 113  ;;  %vm1021_vm9 = vcmp.lt.s32.totalorder %v1748_v31, 112  ;;  %vm1045_vm10 = vcmp.lt.s32.totalorder %v1748_v31, 111 }
  0x61   : > { %1253 = vmatprep.subr.bf16.mxu1 %v1402_v33 }
  0x64   : > { %1255 = vmatpush1.bf16.msra.mxu1 %v1404_v34  ;;  %v1189_v34 = vld [vmem:[%s1886_s8 + $0x2] sm:$0x3] }
  0x65   : > { %1257 = vmatprep.subr.bf16.mxu1 %v1405_v35  ;;  %v1753_v35 = vsub.s32 0, %v867_v30 }
  0x68   : > { %1259 = vmatpush1.bf16.msra.mxu1 %v1407_v36  ;;  %v1755_v36 = vsub.s32 1, %v867_v30 }
  0x69   : > { %1261 = vmatprep.subr.bf16.mxu1 %v1408_v37  ;;  %v864_v37 = vld [vmem:[%s1886_s8] sm:$0x3] }
  0x6c   : > { %1263 = vmatpush1.bf16.msra.mxu1 %v1410_v38  ;;  %v1190_v38 = vld [vmem:[%s1886_s8 + $0x4] sm:$0x3] }
  0x6d   : > { %1265 = vmatprep.subr.bf16.mxu1 %v1411_v39  ;;  %v893_v39 = vrot.slane %v1189_v34, %v1753_v35 }
  0x70   : > { %1267 = vmatpush1.bf16.msra.mxu1 %v1413_v40  ;;  %v897_v40 = vrot.slane %v1189_v34, %v1755_v36 }
  0x71   : > { %1269 = vmatprep.subr.bf16.mxu1 %v1414_v41  ;;  %v869_v41 = vrot.slane %v864_v37, %v1753_v35 }
  0x74   : > { %1271 = vmatpush1.bf16.msra.mxu1 %v1416_v42 }
  0xb5   : > { %v355_v43 = vpop.permute.xlu0 %354 }
  0xb9   : > { %v1746_v24 = vpop.permute.xlu0 %1068 }
  0xc3   : > { %v439_v2 = vpop.permute.xlu1 %438 }
 0x114   : > { %v427_v44 = vpop.f32.mrb[0].mxu0 }
 0x115   : > { %v428_v45 = vadd.f32 %v427_v44, %v355_v43  ;;  %v429_v46 = vpop.f32.mrb[1].mxu0  ;;  %v1191_v44 = vld [vmem:[%s1886_s8 + $0x6] sm:$0x3] }
 0x116   : > { %v430_v47 = vadd.f32 %v429_v46, %v355_v43  ;;  %v917_v46 = vrot.slane %v1190_v38, %v1753_v35 }
 0x117   : > { %v432_v49 = vmax.f32 %v428_v45, 0.0  ;;  %v873_v45 = vrot.slane %v864_v37, %v1755_v36 }
 0x118   : > { %v433_v48 = vmax.f32 %v430_v47, 0.0  ;;  %v921_v47 = vrot.slane %v1190_v38, %v1755_v36  ;;  %v1196_v38 = vld [vmem:[%s1886_s8 + $0x10] sm:$0x3] }
 0x11a   : > { %1175 = vmatprep.subr.msk.mxu0 %vm445_vm1, %v433_v48  ;;  %687 = vmatprep.mubr.f32.mxu1 %v433_v48 }
 0x11b   : > { %1176 = vmatpush1.msk.msra.mxu0 %vm445_vm1, %v432_v49  ;;  %688 = vmatmul.mubr.f32.vlgmr.msra.gmra.mrb[0].mxu1 %v432_v49 }
 0x11c   : > { %1177 = vmatmul.mubr.msk.f32.vlgmr.msra.gmra.mrb[2].mxu0 %vm441_vm2, %v434_v50 }
 0x11d   : > { %800 = vmatprep.mubr.f32.mxu0 %v1516_v0 }
 0x1ee   : > { %v689_v52 = vpop.f32.mrb[0].mxu1 }
 0x1ef   : > { %v691_v53 = vpop.f32.mrb[1].mxu1  ;;  %v518_v55 = vpop.f32.mrb[2].mxu0 }
 0x1f0   : > { %1178 = vmatprep.subr.msk.mxu0 %vm445_vm1, %v691_v53  ;;  %v520_v56 = vpop.f32.mrb[3].mxu0  ;;  %v519_v3 = vadd.f32 %v518_v55, %v439_v2 }
 0x1f1   : > { %1179 = vmatpush1.msk.msra.mxu0 %vm445_vm1, %v689_v52  ;;  %v521_v4 = vadd.f32 %v520_v56, %v439_v2  ;;  %v941_v56 = vrot.slane %v1191_v44, %v1753_v35  ;;  %v1193_v2 = vld [vmem:[%s1886_s8 + $0xa] sm:$0x3] }
 0x1f2   : > { %1180 = vmatmul.mubr.msk.f32.vlgmr.msra.gmra.mrb[4].mxu0 %vm441_vm2, %v694_v54  ;;  %v523_v5 = vmax.f32 %v519_v3, 0.0 }
 0x1f3   : > { %806 = vmatprep.mubr.f32.mxu0 %v1516_v0  ;;  %v524_v6 = vmax.f32 %v521_v4, 0.0 }
 0x1f4   : > { %525 = vst [vmem:[%s1736_s28] sm:$0xff] %v523_v5 }
 0x1f5   : > { %526 = vst [vmem:[%s1736_s28 + $0x8] sm:$0xff] %v524_v6 }
 0x1f6   : > { %1181 = vmatmul.mubr.msk.f32.gmra.mrb[6].mxu0 %vm441_vm2, %v695_v57  ;;  %v945_v57 = vrot.slane %v1191_v44, %v1755_v36 }
 0x1f7   : > { %812 = vmatprep.mubr.f32.mxu0 %v1516_v0 }
 0x1fa   : > { %1182 = vmatmul.mubr.msk.f32.gmra.mrb[8].mxu0 %vm441_vm2, %v696_v58 }
 0x1fb   : > { %818 = vmatprep.mubr.f32.mxu0 %v1516_v0 }
 0x1fe   : > { %1183 = vmatmul.mubr.msk.f32.gmra.mrb[10].mxu0 %vm441_vm2, %v697_v59 }
 0x1ff   : > { %824 = vmatprep.mubr.f32.mxu0 %v1516_v0 }
 0x202   : > { %1184 = vmatmul.mubr.msk.f32.gmra.mrb[12].mxu0 %vm441_vm2, %v698_v60  ;;  %v1192_v60 = vld [vmem:[%s1886_s8 + $0x8] sm:$0x3] }
 0x203   : > { %830 = vmatprep.mubr.f32.mxu0 %v1516_v0 }
 0x206   : > { %1185 = vmatmul.mubr.msk.f32.gmra.mrb[14].mxu0 %vm441_vm2, %v699_v61 }
 0x207   : > { %836 = vmatprep.mubr.f32.mxu0 %v1516_v0 }
 0x20a   : > { %1186 = vmatmul.mubr.msk.f32.gmra.mrb[16].mxu0 %vm441_vm2, %v700_v62 }
 0x20b   : > { %842 = vmatprep.mubr.f32.mxu0 %v1516_v0 }
 0x20e   : > { %1187 = vmatmul.mubr.msk.f32.gmra.mrb[18].mxu0 %vm441_vm2, %v701_v63 }
 0x20f   : > { %848 = vmatprep.mubr.f32.mxu0 %v1516_v0 }
 0x212   : > { %1188 = vmatmul.mubr.msk.f32.gmra.mrb[20].mxu0 %vm441_vm2, %v702_v1 }
 0x2c5   : > { %v802_v0 = vpop.f32.mrb[4].mxu0 }
 0x2c6   : > { %v804_v7 = vpop.f32.mrb[5].mxu0  ;;  %855 = vrot.lane.b32.xlu0 %v802_v0, %s1518_s24 }
 0x2c7   : > { %857 = vrot.lane.b32.xlu1 %v804_v7, %s1518_s24 }
 0x2c9   : > { %v808_v8 = vpop.f32.mrb[6].mxu0 }
 0x2ca   : > { %v810_v9 = vpop.f32.mrb[7].mxu0 }
 0x2cb   : > { %880 = vrot.lane.b32.xlu1 %v808_v8, %s1519_s23  ;;  %882 = vrot.lane.b32.xlu0 %v810_v9, %s1519_s23  ;;  %v1194_v8 = vld [vmem:[%s1886_s8 + $0xc] sm:$0x3]  ;;  %v958_v9 = vrot.slane %v1192_v60, %v1753_v35 }
 0x2cd   : > { %v814_v10 = vpop.f32.mrb[8].mxu0 }
 0x2ce   : > { %v816_v11 = vpop.f32.mrb[9].mxu0 }
 0x2cf   : > { %904 = vrot.lane.b32.xlu1 %v814_v10, %s1520_s27  ;;  %906 = vrot.lane.b32.xlu0 %v816_v11, %s1520_s27  ;;  %v962_v10 = vrot.slane %v1192_v60, %v1755_v36  ;;  %v982_v11 = vrot.slane %v1193_v2, %v1753_v35 }
 0x2d1   : > { %v820_v12 = vpop.f32.mrb[10].mxu0 }
 0x2d2   : > { %v822_v13 = vpop.f32.mrb[11].mxu0 }
 0x2d3   : > { %928 = vrot.lane.b32.xlu1 %v820_v12, %s1521_s21  ;;  %930 = vrot.lane.b32.xlu0 %v822_v13, %s1521_s21  ;;  %s1830_s21 = scalar_lea.hbm %s1887_s9, %s1203_s26 }
 0x2d5   : > { %v1742_v14 = vpop.f32.mrb[12].mxu0 }
 0x2d6   : > { %v1744_v15 = vpop.f32.mrb[13].mxu0 }
 0x2d9   : > { %v832_v16 = vpop.f32.mrb[14].mxu0 }
 0x2da   : > { %v834_v17 = vpop.f32.mrb[15].mxu0  ;;  %969 = vrot.lane.b32.xlu1 %v832_v16, %s1522_s29  ;;  %v986_v16 = vrot.slane %v1193_v2, %v1755_v36 }
 0x2db   : > { %971 = vrot.lane.b32.xlu0 %v834_v17, %s1522_s29  ;;  %v1195_v17 = vld [vmem:[%s1886_s8 + $0xe] sm:$0x3]  ;;  %s1445_s29 = scalar_lea.vmem %s1825_s25, 512 }
 0x2dc   : > { %v1034_v30 = vrot.slane %v1195_v17, %v1755_v36  ;;  %p1446_p6 = scmp.ne.s32.totalorder %s1825_s25, %s1445_s29 }
 0x2dd   : > { %v838_v18 = vpop.f32.mrb[16].mxu0 }
 0x2de   : > { %v840_v19 = vpop.f32.mrb[17].mxu0  ;;  %993 = vrot.lane.b32.xlu1 %v838_v18, %s1523_s14  ;;  %p1447_p10 = pnand %p1446_p6, %p1898_p9 }
 0x2df   : > { %995 = vrot.lane.b32.xlu0 %v840_v19, %s1523_s14  ;;  %s1526_s14 = smov [#allocation5]  }
 0x2e0   : > { %p1448_p12 = pneg %p1447_p10 }
 0x2e1   : > { %v844_v20 = vpop.f32.mrb[18].mxu0 }
 0x2e2   : > { %v846_v21 = vpop.f32.mrb[19].mxu0 }
 0x2e3   : > { %1017 = vrot.lane.b32.xlu0 %v844_v20, %s1524_s16  ;;  %1019 = vrot.lane.b32.xlu1 %v846_v21, %s1524_s16  ;;  %v1006_v21 = vrot.slane %v1194_v8, %v1753_v35  ;;  %s1449_s16 = sshll.u32 %s1526_s14, 4  ;;  %s1450_s16 = int_to_ptr.vmem [resolvable:$false] %s1449_s16 }
 0x2e4   : > { %p1452_p2 = scmp.lt.s32.totalorder %s1825_s25, %s1450_s16 }
 0x2e5   : > { %v850_v22 = vpop.f32.mrb[20].mxu0 }
 0x2e6   : > { %v852_v23 = vpop.f32.mrb[21].mxu0 }
 0x2e7   : > { %1041 = vrot.lane.b32.xlu1 %v850_v22, %s1525_s22  ;;  %1043 = vrot.lane.b32.xlu0 %v852_v23, %s1525_s22  ;;  %s1451_s22 = scalar_lea.vmem %s1450_s16, 1024 }
 0x2e8   : > { %p1453_p3 = scmp.lt.s32.totalorder %s1451_s22, %s1445_s29 }
 0x2ea   : > { %p1454_p4 = por %p1453_p3, %p1452_p2 }
 0x2ec   : > { %p1455_p7 = pnand %p1454_p4, %p1448_p12 }
 0x338   : > { %v856_v25 = vpop.permute.xlu0 %855 }
 0x339   : > { %v858_v26 = vpop.permute.xlu1 %857 }
 0x33a   : > { %v862_v50 = vsel %vm861_vm4, %v856_v25, %v858_v26  ;;  %v863_v51 = vsel %vm861_vm4, %v858_v26, %v856_v25  ;;  %v1010_v25 = vrot.slane %v1194_v8, %v1755_v36 }
 0x33b   : > { %v876_v61 = vmul.f32 %v869_v41, %v863_v51  ;;  %v877_v62 = vmul.f32 %v873_v45, %v862_v50 }
 0x33d   : > { %v881_v28 = vpop.permute.xlu1 %880  ;;  %v883_v29 = vpop.permute.xlu0 %882 }
 0x33e   : > { %v885_v42 = vsel %vm884_vm3, %v881_v28, %v883_v29  ;;  %v886_v43 = vsel %vm884_vm3, %v883_v29, %v881_v28  ;;  %v1030_v29 = vrot.slane %v1195_v17, %v1753_v35 }
 0x33f   : > { %v900_v54 = vmul.f32 %v893_v39, %v886_v43  ;;  %v901_v55 = vmul.f32 %v897_v40, %v885_v42 }
 0x341   : > { %v905_v32 = vpop.permute.xlu1 %904  ;;  %v907_v33 = vpop.permute.xlu0 %906  ;;  %v902_v4 = vadd.f32 %v900_v54, %v876_v61  ;;  %v903_v5 = vadd.f32 %v901_v55, %v877_v62 }
 0x342   : > { %v909_v52 = vsel %vm908_vm5, %v905_v32, %v907_v33  ;;  %v910_v53 = vsel %vm908_vm5, %v907_v33, %v905_v32  ;;  %v965_v32 = vmul.f32 %v958_v9, %v1742_v14  ;;  %v966_v33 = vmul.f32 %v962_v10, %v1744_v15 }
 0x343   : > { %v924_v63 = vmul.f32 %v917_v46, %v910_v53  ;;  %v925_v1 = vmul.f32 %v921_v47, %v909_v52  ;;  %v1054_v15 = vrot.slane %v1196_v38, %v1753_v35  ;;  %v1058_v46 = vrot.slane %v1196_v38, %v1755_v36 }
 0x345   : > { %v929_v48 = vpop.permute.xlu1 %928  ;;  %v931_v49 = vpop.permute.xlu0 %930  ;;  %v926_v12 = vadd.f32 %v924_v63, %v902_v4  ;;  %v927_v13 = vadd.f32 %v925_v1, %v903_v5 }
 0x346   : > { %v933_v58 = vsel %vm932_vm6, %v929_v48, %v931_v49  ;;  %v934_v59 = vsel %vm932_vm6, %v931_v49, %v929_v48 }
 0x347   : > { %v948_v6 = vmul.f32 %v941_v56, %v934_v59  ;;  %v949_v0 = vmul.f32 %v945_v57, %v933_v58 }
 0x349   : > { %v950_v22 = vadd.f32 %v948_v6, %v926_v12  ;;  %v951_v23 = vadd.f32 %v949_v0, %v927_v13 }
 0x34b   : > { %v967_v39 = vadd.f32 %v965_v32, %v950_v22  ;;  %v968_v40 = vadd.f32 %v966_v33, %v951_v23 }
 0x34c   : > { %v970_v3 = vpop.permute.xlu1 %969 }
 0x34d   : > { %v972_v7 = vpop.permute.xlu0 %971 }
 0x34e   : > { %v974_v18 = vsel %vm973_vm7, %v970_v3, %v972_v7  ;;  %v975_v19 = vsel %vm973_vm7, %v972_v7, %v970_v3 }
 0x34f   : > { %v989_v34 = vmul.f32 %v982_v11, %v974_v18  ;;  %v990_v37 = vmul.f32 %v986_v16, %v975_v19 }
 0x350   : > { %v994_v20 = vpop.permute.xlu1 %993 }
 0x351   : > { %v996_v26 = vpop.permute.xlu0 %995  ;;  %v991_v47 = vadd.f32 %v989_v34, %v967_v39  ;;  %v992_v48 = vadd.f32 %v990_v37, %v968_v40 }
 0x352   : > { %v998_v27 = vsel %vm997_vm8, %v994_v20, %v996_v26  ;;  %v999_v28 = vsel %vm997_vm8, %v996_v26, %v994_v20 }
 0x353   : > { %v1013_v41 = vmul.f32 %v1006_v21, %v998_v27  ;;  %v1014_v42 = vmul.f32 %v1010_v25, %v999_v28 }
 0x355   : > { %v1018_v43 = vpop.permute.xlu0 %1017  ;;  %v1020_v44 = vpop.permute.xlu1 %1019  ;;  %v1015_v51 = vadd.f32 %v1013_v41, %v991_v47  ;;  %v1016_v52 = vadd.f32 %v1014_v42, %v992_v48 }
 0x356   : > { %v1022_v45 = vsel %vm1021_vm9, %v1018_v43, %v1020_v44  ;;  %v1023_v14 = vsel %vm1021_vm9, %v1020_v44, %v1018_v43 }
 0x357   : > { %v1037_v49 = vmul.f32 %v1030_v29, %v1022_v45  ;;  %v1038_v50 = vmul.f32 %v1034_v30, %v1023_v14 }
 0x359   : > { %v1042_v53 = vpop.permute.xlu1 %1041  ;;  %v1044_v54 = vpop.permute.xlu0 %1043  ;;  %v1039_v35 = vadd.f32 %v1037_v49, %v1015_v51  ;;  %v1040_v36 = vadd.f32 %v1038_v50, %v1016_v52 }
 0x35a   : > { %v1046_v55 = vsel %vm1045_vm10, %v1042_v53, %v1044_v54  ;;  %v1047_v56 = vsel %vm1045_vm10, %v1044_v54, %v1042_v53 }
 0x35b   : > { %v1061_v57 = vmul.f32 %v1054_v15, %v1046_v55  ;;  %v1062_v58 = vmul.f32 %v1058_v46, %v1047_v56 }
 0x35d   : > { %v1063_v59 = vadd.f32 %v1061_v57, %v1039_v35  ;;  %v1064_v60 = vadd.f32 %v1062_v58, %v1040_v36 }
 0x35f   : > { %v1071_v61 = vadd.f32 %v1746_v24, %v1063_v59  ;;  %v1072_v62 = vadd.f32 %v1746_v24, %v1064_v60 }
 0x361   : > { %v1073_v31 = vmax.f32 %v1071_v61, 0.0  ;;  %v1074_v63 = vmax.f32 %v1072_v62, 0.0 }
 0x363   : > { %1075 = vst [vmem:[%s1736_s28 + $0x10] sm:$0xff] %v1073_v31  ;;  %1076 = vst [vmem:[%s1736_s28 + $0x18] sm:$0xff] %v1074_v63 }
 0x364   : > { %1458 = shalt.err (!%p1455_p7)
}
 0x365   : > { %s1459_s17 = scalar_lea.hbm %s1830_s21, 512  ;;  %s1463_s24 = scalar_lea.hbm %s1887_s9, 1024 }
 0x366   : > { %p1460_p8 = scmp.ne.s32.totalorder %s1830_s21, %s1459_s17  ;;  %p1464_p1 = scmp.lt.u32.totalorder %s1830_s21, %s1887_s9 }
 0x367   : > { %p1465_p0 = scmp.lt.u32.totalorder %s1463_s24, %s1459_s17  ;;  %p1467_p6 = scmp.lt.u32.totalorder %s1459_s17, %s1830_s21 }
 0x368   : > { %p1461_p11 = pnand %p1460_p8, %p1898_p9 }
 0x369   : > { %p1466_p5 = por %p1465_p0, %p1464_p1 }
 0x36a   : > { %p1462_p13 = pneg %p1461_p11 }
 0x36b   : > { %p1468_p10 = por %p1467_p6, %p1466_p5 }
 0x36d   : > { %p1469_p12 = pnand %p1468_p10, %p1462_p13 }
 0x36f   : > { %1472 = shalt.err (!%p1469_p12)
}
 0x370   : > { %s1527_s29 = smov 256  }
 0x371   : > { %1308 = dma.vmem_to_hbm [thread:$0]  (%p1898_p9), %s1825_s25, 512, %s1830_s21, %s1836_s13, %s1527_s29, %s1527_s29, %s1519_s23  }
 0x372 PF: > { %p1320_p2 = scmp.ge.s32.totalorder %s1511_s12, 2  ;;  %s1106_s16 = sand.u32 1, %s1499_s30  }
 0x373   : > { %p1899_p3 = scmp.ne.s32.totalorder %s1892_s20, 0  ;;  %s1107_s22 = scalar_lea.sflag [#allocation4], %s1106_s16 }
 0x375   : > { %p1315_p4 = pnand %p1320_p2, %p1899_p3 }
 0x377   : > { %1494 = dma.done.wait (!%p1315_p4), %s1107_s22, 512  }
 0x378   : > { %1496 = vsyncadd (!%p1315_p4), %s1107_s22, 4294966784  ;;  %p20_p7 = scmp.ge.s32.totalorder %s1603_s15, 4   ;;  %s1900_s30 = smov %s1503_s10 }
 0x379   : > { %s1901_s10 = smov %s1507_s11  ;;  %s1902_s11 = smov %s1614_s18 }
 0x37a   : > { %s1903_s12 = smov %s1603_s15  ;;  %22 = sbr.rel (!%p20_p7) target bundleno = 4 (0x4), region = 104 }
 0x381   :  { %1112 = vsyncpa [#allocation3], 1 }
 0x382   :  { %1114 = vsyncpa [#allocation3 + $0x1], 1 }
 0x383   :  { %1115 = vsyncpa [#allocation4], 1 }
 0x384   :  { %1117 = vsyncpa [#allocation4 + $0x1], 1 }

</bundles_post_ra>
